<compile_context>
chip_gen: v6e
topology: v6e:2x2x1
jax: 0.10.0
libtpu: 0.0.40
codegen_flags: <defaults>
</compile_context>

<pallas_src>
import functools

import jax
import jax.numpy as jnp
from jax.experimental import pallas as pl
from jax.experimental.pallas import tpu as pltpu


def _round_up(n: int, m: int) -> int:
    return ((n + m - 1) // m) * m


# ----------------------------------------------------------------------------
# Kernel: one batch tile (TB, Cp) of logits + (TB, 1) labels -> running loss.
#   grid axis 0 = batch tiles (accumulated into the resident (1,1) output).
# ----------------------------------------------------------------------------
def _ce_label_smooth_kernel(x_ref,      # (TB, Cp) f32 logits tile (padded)
                            tgt_ref,    # (TB, 1)  i32 labels tile (padded)
                            loss_ref,   # (1, 1)   f32 resident output
                            *,
                            batch: int,
                            num_classes: int,
                            epsilon: float,
                            block_b: int):
    i = pl.program_id(0)

    @pl.when(i == 0)
    def _():
        loss_ref[...] = jnp.zeros_like(loss_ref)

    x = x_ref[...].astype(jnp.float32)                     # (TB, Cp)
    tgt = tgt_ref[...]                                     # (TB, 1) int32

    tb, cp = x.shape
    col = jax.lax.broadcasted_iota(jnp.int32, (tb, cp), 1)
    row = jax.lax.broadcasted_iota(jnp.int32, (tb, cp), 0) + i * block_b
    col_valid = col < num_classes                          # mask padded classes
    row_valid = row < batch                                # mask padded batch rows
    valid = jnp.logical_and(col_valid, row_valid)

    # log-softmax over the (real) class axis; padded lanes forced to -1e30 so
    # they do not contribute to the row max or the exp-sum.
    xm = jnp.where(col_valid, x, jnp.float32(-1e30))
    m = jnp.max(xm, axis=1, keepdims=True)                 # (TB, 1)
    e = jnp.exp(xm - m)
    denom = jnp.sum(e, axis=1, keepdims=True)              # (TB, 1)
    log_probs = xm - m - jnp.log(denom)                    # (TB, Cp)

    # one-hot via lane iota vs. label column (replaces torch scatter_)
    onehot = (col == tgt).astype(jnp.float32)              # (TB, Cp)
    smooth = (1.0 - epsilon) * onehot + (epsilon / num_classes)

    contrib = jnp.where(valid, smooth * log_probs, 0.0)
    # mean over batch then sum over classes == total-sum / batch
    partial = -jnp.sum(contrib, keepdims=True) / jnp.float32(batch)   # (1, 1)
    loss_ref[...] = loss_ref[...] + partial


# ----------------------------------------------------------------------------
# Wrapper: pad to (8, 128)-aligned shapes, run one fused pallas_call.
# ----------------------------------------------------------------------------
def cross_entropy_label_smooth(logits, targets, num_classes,
                               epsilon: float = 0.1, max_block_b: int = 256):
    B, C = logits.shape
    Cp = _round_up(C, 128)                       # lane-aligned class axis
    TB = min(_round_up(B, 8), max_block_b)       # sublane-aligned batch tile
    Bp = _round_up(B, TB)

    x_pad = jnp.zeros((Bp, Cp), jnp.float32).at[:B, :C].set(
        logits.astype(jnp.float32))
    t_pad = jnp.zeros((Bp, 1), jnp.int32).at[:B, 0].set(
        targets.astype(jnp.int32))

    kernel = functools.partial(_ce_label_smooth_kernel,
                               batch=B, num_classes=num_classes,
                               epsilon=float(epsilon), block_b=TB)

    loss = pl.pallas_call(
        kernel,
        out_shape=jax.ShapeDtypeStruct((1, 1), jnp.float32),
        grid_spec=pltpu.PrefetchScalarGridSpec(
            num_scalar_prefetch=0,
            grid=(Bp // TB,),
            in_specs=[
                pl.BlockSpec((TB, Cp), lambda i: (i, 0)),
                pl.BlockSpec((TB, 1), lambda i: (i, 0)),
            ],
            out_specs=pl.BlockSpec((1, 1), lambda i: (0, 0)),
        ),
        compiler_params=pltpu.CompilerParams(
            dimension_semantics=("arbitrary",)),
    )(x_pad, t_pad)
    return loss[0, 0]


# ----------------------------------------------------------------------------
# Pure-JAX reference of the PyTorch forward (for correctness check only).
# ----------------------------------------------------------------------------
def _reference(logits, targets, num_classes, epsilon=0.1):
    lp = jax.nn.log_softmax(logits.astype(jnp.float32), axis=1)
    onehot = jax.nn.one_hot(targets, num_classes, dtype=jnp.float32)
    sm = (1.0 - epsilon) * onehot + epsilon / num_classes
    return jnp.sum(jnp.mean(-sm * lp, axis=0))


if __name__ == "__main__":
    B, num_classes = 4, 751          # small batch, typical re-ID class count
    epsilon = 0.1

    key = jax.random.PRNGKey(0)
    k_x, k_t = jax.random.split(key)
    logits = jax.random.normal(k_x, (B, num_classes), jnp.float32)
    targets = jax.random.randint(k_t, (B,), 0, num_classes, jnp.int32)

    loss = cross_entropy_label_smooth(logits, targets, num_classes, epsilon)
    loss = jax.block_until_ready(loss)

    ref = jax.block_until_ready(_reference(logits, targets, num_classes, epsilon))
    assert loss.shape == ()
    assert jnp.isfinite(loss)
    assert abs(float(loss) - float(ref)) < 1e-4, (float(loss), float(ref))
    print("KERNEL_OK")
</pallas_src>

<mosaic_0001>
module attributes {stable_mosaic.version = 11 : i64} {
  func.func @_ce_label_smooth_kernel(%arg0: i32, %arg1: memref<8x768xf32, #tpu.memory_space<vmem>>, %arg2: memref<8x1xi32, #tpu.memory_space<vmem>>, %arg3: memref<1x1xf32, #tpu.memory_space<vmem>>) attributes {dimension_semantics = [#tpu.dimension_semantics<arbitrary>], iteration_bounds = array<i64: 1>, scalar_prefetch = 0 : i64, scratch_operands = 0 : i64, tpu.core_type = #tpu.core_type<tc>, window_params = [{transform_indices = @transform_0, window_bounds = array<i64: 8, 768>}, {transform_indices = @transform_1, window_bounds = array<i64: 8, 1>}, {pipeline_mode = #tpu.pipeline_mode<synchronous>, transform_indices = @transform_2, window_bounds = array<i64: 1, 1>}]} {
    %c0_i32 = arith.constant 0 : i32
    %0 = arith.cmpi eq, %arg0, %c0_i32 : i32
    %1 = arith.extui %0 : i1 to i32
    %c0_i32_0 = arith.constant 0 : i32
    %2 = arith.cmpi ne, %1, %c0_i32_0 : i32
    scf.if %2 {
      %cst_16 = arith.constant 0.000000e+00 : f32
      %52 = vector.broadcast %cst_16 : f32 to vector<1x1xf32>
      %c0_17 = arith.constant 0 : index
      %c0_18 = arith.constant 0 : index
      %53 = vector.load %arg3[%c0_17, %c0_18] : memref<1x1xf32, #tpu.memory_space<vmem>>, vector<1x1xf32>
      tpu.vector_store %arg3[%c0_17, %c0_18], %52 {strides = array<i32>} : memref<1x1xf32, #tpu.memory_space<vmem>>, vector<1x1xf32>,
    } else {
    }
    %c0 = arith.constant 0 : index
    %c0_1 = arith.constant 0 : index
    %3 = vector.load %arg1[%c0, %c0_1] : memref<8x768xf32, #tpu.memory_space<vmem>>, vector<8x768xf32>
    %c0_2 = arith.constant 0 : index
    %c0_3 = arith.constant 0 : index
    %4 = vector.load %arg2[%c0_2, %c0_3] : memref<8x1xi32, #tpu.memory_space<vmem>>, vector<8x1xi32>
    %5 = tpu.iota {dimensions = array<i32: 1>} : vector<8x768xi32>
    %6 = tpu.iota {dimensions = array<i32: 0>} : vector<8x768xi32>
    %c8_i32 = arith.constant 8 : i32
    %7 = arith.muli %arg0, %c8_i32 : i32
    %8 = vector.broadcast %7 : i32 to vector<8x768xi32>
    %9 = arith.addi %6, %8 : vector<8x768xi32>
    %c751_i32 = arith.constant 751 : i32
    %10 = vector.broadcast %c751_i32 : i32 to vector<8x768xi32>
    %11 = arith.cmpi slt, %5, %10 : vector<8x768xi32>
    %c4_i32 = arith.constant 4 : i32
    %12 = vector.broadcast %c4_i32 : i32 to vector<8x768xi32>
    %13 = arith.cmpi slt, %9, %12 : vector<8x768xi32>
    %14 = arith.andi %11, %13 : vector<8x768xi1>
    %cst = arith.constant -1.000000e+30 : f32
    %15 = vector.broadcast %cst : f32 to vector<8x768xf32>
    %16 = arith.select %11, %3, %15 : vector<8x768xi1>, vector<8x768xf32>
    %cst_4 = arith.constant dense<0xFF800000> : vector<8xf32>
    %17 = vector.multi_reduction <maximumf>, %16, %cst_4 [1] : vector<8x768xf32> to vector<8xf32>
    %18 = vector.shape_cast %17 : vector<8xf32> to vector<8x1xf32>
    %19 = vector.broadcast %18 : vector<8x1xf32> to vector<8x768xf32>
    %20 = arith.subf %16, %19 : vector<8x768xf32>
    %21 = math.exp %20 : vector<8x768xf32>
    %cst_5 = arith.constant dense<0.000000e+00> : vector<8xf32>
    %22 = vector.multi_reduction <add>, %21, %cst_5 [1] : vector<8x768xf32> to vector<8xf32>
    %23 = vector.shape_cast %22 : vector<8xf32> to vector<8x1xf32>
    %24 = vector.broadcast %18 : vector<8x1xf32> to vector<8x768xf32>
    %25 = arith.subf %16, %24 : vector<8x768xf32>
    %26 = math.log %23 : vector<8x1xf32>
    %27 = vector.broadcast %26 : vector<8x1xf32> to vector<8x768xf32>
    %28 = arith.subf %25, %27 : vector<8x768xf32>
    %29 = vector.broadcast %4 : vector<8x1xi32> to vector<8x768xi32>
    %30 = arith.cmpi eq, %5, %29 : vector<8x768xi32>
    %31 = arith.extui %30 : vector<8x768xi1> to vector<8x768xi32>
    %32 = arith.sitofp %31 : vector<8x768xi32> to vector<8x768xf32>
    %cst_6 = arith.constant 0.899999976 : f32
    %33 = vector.broadcast %cst_6 : f32 to vector<8x768xf32>
    %34 = arith.mulf %33, %32 : vector<8x768xf32>
    %cst_7 = arith.constant 1.33155787E-4 : f32
    %35 = vector.broadcast %cst_7 : f32 to vector<8x768xf32>
    %36 = arith.addf %34, %35 : vector<8x768xf32>
    %37 = arith.mulf %36, %28 : vector<8x768xf32>
    %cst_8 = arith.constant 0.000000e+00 : f32
    %38 = vector.broadcast %cst_8 : f32 to vector<8x768xf32>
    %39 = arith.select %14, %37, %38 : vector<8x768xi1>, vector<8x768xf32>
    %40 = vector.shape_cast %39 : vector<8x768xf32> to vector<1x8x768xf32>
    %cst_9 = arith.constant dense<0.000000e+00> : vector<1xf32>
    %41 = vector.multi_reduction <add>, %40, %cst_9 [1, 2] : vector<1x8x768xf32> to vector<1xf32>
    %42 = vector.shape_cast %41 : vector<1xf32> to vector<1x1x1xf32>
    %43 = vector.extract %42[0, 0, 0] : f32 from vector<1x1x1xf32>
    %44 = vector.broadcast %43 : f32 to vector<1x1xf32>
    %cst_10 = arith.constant 0.000000e+00 : f32
    %45 = vector.broadcast %cst_10 : f32 to vector<1x1xf32>
    %46 = arith.subf %45, %44 : vector<1x1xf32>
    %cst_11 = arith.constant 4.000000e+00 : f32
    %47 = vector.broadcast %cst_11 : f32 to vector<1x1xf32>
    %48 = arith.divf %46, %47 : vector<1x1xf32>
    %c0_12 = arith.constant 0 : index
    %c0_13 = arith.constant 0 : index
    %49 = vector.load %arg3[%c0_12, %c0_13] : memref<1x1xf32, #tpu.memory_space<vmem>>, vector<1x1xf32>
    %50 = arith.addf %49, %48 : vector<1x1xf32>
    %c0_14 = arith.constant 0 : index
    %c0_15 = arith.constant 0 : index
    %51 = vector.load %arg3[%c0_14, %c0_15] : memref<1x1xf32, #tpu.memory_space<vmem>>, vector<1x1xf32>
    tpu.vector_store %arg3[%c0_14, %c0_15], %50 {strides = array<i32>} : memref<1x1xf32, #tpu.memory_space<vmem>>, vector<1x1xf32>,
    return
  }
  func.func @transform_0(%arg0: i32) -> (i32, i32) {
    %c0_i32 = arith.constant 0 : i32
    %c0_i32_0 = arith.constant 0 : i32
    return %arg0, %c0_i32 : i32, i32
  }
  func.func @transform_1(%arg0: i32) -> (i32, i32) {
    %c0_i32 = arith.constant 0 : i32
    %c0_i32_0 = arith.constant 0 : i32
    return %arg0, %c0_i32 : i32, i32
  }
  func.func @transform_2(%arg0: i32) -> (i32, i32) {
    %c0_i32 = arith.constant 0 : i32
    %c0_i32_0 = arith.constant 0 : i32
    %c0_i32_1 = arith.constant 0 : i32
    return %c0_i32, %c0_i32_0 : i32, i32
  }
}

</mosaic_0001>

<bundles_post_ra>
// kernel: tpu_custom_call.1
= control target key start
LH: loop header
LB: loop body
LE: loop exit
PB: predicated region body
PF: predicated region fallthrough
CT: control target
= control target key end

     0   :  { %7 = vsyncpa [#allocation3], 0  ;;  %s347_s0 = inlined_call_operand.hbm [shape: f32[8,768], index: 0, kind: input, shape index: {}]   ;;  %s348_s1 = inlined_call_operand.vmem [shape: s32[8,1], index: 1, kind: input, shape index: {}]   ;;  %s349_s2 = inlined_call_operand.hbm [shape: f32[1,1], index: 2, kind: output, shape index: {}]  }
   0x1   :  { %8 = vsyncpa [#allocation4], 0  ;;  %s262_s9 = smov [#allocation2]  }
   0x2   :  { %s15_s10 = sshll.u32 %s262_s9, 4  ;;  %s16_s10 = int_to_ptr.vmem [resolvable:$true] %s15_s10 }
   0x3   :  { %s226_s11 = scalar_lea.vmem %s16_s10, 768  ;;  %p231_p1 = scmp.lt.s32.totalorder %s16_s10, %s16_s10 }
   0x4   :  { %p227_p0 = scmp.ne.s32.totalorder %s16_s10, %s226_s11  ;;  %p232_p2 = scmp.lt.s32.totalorder %s226_s11, %s226_s11 }
   0x6   :  { %p233_p3 = por %p232_p2, %p231_p1 }
   0x8   :  { %p234_p4 = pnand %p233_p3, %p227_p0 }
   0xa   :  { %237 = shalt.err (!%p234_p4)
}
   0xb   :  { %18 = dma.hbm_to_vmem [thread:$0]  %s347_s0, 768, %s16_s10, [#allocation3]  }
   0xc   :  { %258 = dma.done.wait [#allocation3], 768  }
   0xd   :  { %259 = vsyncadd [#allocation3], 4294966528  ;;  %vm28_vm0 = vcmask 0   ;;  %v37_v0 = vlaneseq  ;;  %v263_v1 = vmov 0.0   ;;  %v30_v4 = vld [vmem:[#allocation2] sm:$0xff]  ;;  %v31_v5 = vld [vmem:[#allocation2 + $0x8] sm:$0xff] }
   0xe   :  { %29 = vst.msk [vmem:[#allocation5] sm:$0x1] %vm28_vm0, %v263_v1  ;;  %v32_v6 = vld [vmem:[#allocation2 + $0x10] sm:$0xff]  ;;  %v33_v7 = vld [vmem:[#allocation2 + $0x18] sm:$0xff]  ;;  %v34_v8 = vld [vmem:[#allocation2 + $0x20] sm:$0xff]  ;;  %v264_v17 = vmov 0  }
   0xf   :  { %v287_v2 = vand.u32 127, %v37_v0  ;;  %v35_v9 = vld [vmem:[#allocation2 + $0x28] sm:$0xff]  ;;  %v68_v11 = vmax.f32 %v30_v4, %v34_v8  ;;  %v71_v13 = vmax.f32 %v32_v6, %v33_v7  ;;  %v36_v16 = vld [vmem:[%s348_s1] sm:$0xff]  ;;  %202 = vset.pattern.permute.xlu1 %v264_v17  ;;  %203 = vset.pattern.permute.xlu0 %v264_v17  ;;  %v45_v60 = vshrl.u32 %v37_v0, 7  ;;  %s265_s15 = smov [#allocation5]  }
  0x10   :  { %109 = vperm.xlu1 %202, %v36_v16   ;;  %s181_s16 = sshll.u32 %s265_s15, 4  ;;  %s182_s16 = int_to_ptr.vmem [resolvable:$true] %s181_s16 }
  0x11   :  { %v290_v3 = vadd.s32 640, %v287_v2  ;;  %v39_v43 = vadd.s32 128, %v287_v2  ;;  %v40_v44 = vadd.s32 256, %v287_v2  ;;  %v41_v46 = vadd.s32 384, %v287_v2  ;;  %s238_s17 = scalar_lea.vmem %s182_s16, 16  ;;  %s242_s18 = scalar_lea.vmem %s182_s16, 32 }
  0x12   :  { %v42_v47 = vadd.s32 512, %v287_v2  ;;  %vm55_vm8 = vcmp.lt.s32.totalorder %v45_v60, 4  ;;  %p239_p5 = scmp.ne.s32.totalorder %s182_s16, %s238_s17  ;;  %p243_p6 = scmp.lt.s32.totalorder %s182_s16, %s182_s16 }
  0x13   :  { %vm54_vm1 = vcmp.lt.s32.totalorder %v290_v3, 751  ;;  %p244_p7 = scmp.lt.s32.totalorder %s242_s18, %s238_s17 }
  0x14   :  { %v67_v10 = vsel %vm54_vm1, %v35_v9, -1e+30  ;;  %vm61_vm9 = vmand %vm54_vm1, %vm55_vm8 }
  0x15   :  { %v69_v12 = vmax.f32 %v31_v5, %v67_v10  ;;  %p245_p8 = por %p244_p7, %p243_p6 }
  0x17   :  { %v70_v14 = vmax.f32 %v68_v11, %v69_v12  ;;  %p246_p9 = pnand %p245_p8, %p239_p5 }
  0x19   :  { %v72_v15 = vmax.f32 %v70_v14, %v71_v13 }
  0x1b   :  { %73 = vmax.xlane.f32.xlu0 %v72_v15 }
  0x8b   :  { %v110_v45 = vpop.permute.xlu1 %109 }
  0x8c   :  { %vm111_vm2 = vcmp.eq.s32.totalorder %v287_v2, %v110_v45  ;;  %vm112_vm3 = vcmp.eq.s32.totalorder %v39_v43, %v110_v45  ;;  %vm113_vm4 = vcmp.eq.s32.totalorder %v40_v44, %v110_v45  ;;  %vm114_vm5 = vcmp.eq.s32.totalorder %v41_v46, %v110_v45 }
  0x8d   :  { %v190_v48 = vsel %vm111_vm2, 1.0, %v263_v1  ;;  %v191_v49 = vsel %vm112_vm3, 1.0, %v263_v1  ;;  %v192_v50 = vsel %vm113_vm4, 1.0, %v263_v1  ;;  %vm115_vm6 = vcmp.eq.s32.totalorder %v42_v47, %v110_v45 }
  0x8e   :  { %v193_v51 = vsel %vm114_vm5, 1.0, %v263_v1  ;;  %v129_v52 = vmul.f32 0.9, %v190_v48  ;;  %vm116_vm7 = vcmp.eq.s32.totalorder %v290_v3, %v110_v45  ;;  %v130_v53 = vmul.f32 0.9, %v191_v49 }
  0x8f   :  { %v194_v54 = vsel %vm115_vm6, 1.0, %v263_v1  ;;  %v131_v55 = vmul.f32 0.9, %v192_v50  ;;  %v132_v56 = vmul.f32 0.9, %v193_v51  ;;  %v195_v57 = vsel %vm116_vm7, 1.0, %v263_v1 }
  0x90   :  { %v135_v59 = vadd.f32 0.00013315579, %v129_v52  ;;  %v133_v61 = vmul.f32 0.9, %v194_v54  ;;  %v136_v63 = vadd.f32 0.00013315579, %v130_v53 }
  0x91   :  { %v137_v2 = vadd.f32 0.00013315579, %v131_v55  ;;  %v171_v3 = vld [vmem:[#allocation5] sm:$0x1] }
  0x92   :  { %v139_v1 = vadd.f32 0.00013315579, %v133_v61 }
  0xa4   :  { %v74_v18 = vpop.xlane.xlu0 %73 }
  0xa5   :  { %v298_v19 = vsub.f32 %v30_v4, %v74_v18  ;;  %v300_v20 = vsub.f32 %v31_v5, %v74_v18  ;;  %v302_v21 = vsub.f32 %v32_v6, %v74_v18  ;;  %v304_v22 = vsub.f32 %v33_v7, %v74_v18 }
  0xa6   :  { %v308_v25 = vsub.f32 %v34_v8, %v74_v18  ;;  %v311_v27 = vsub.f32 %v67_v10, %v74_v18  ;;  %v134_v4 = vmul.f32 0.9, %v195_v57  ;;  %v138_v5 = vadd.f32 0.00013315579, %v132_v56 }
  0xa7   :  { %v81_v23 = vmul.f32 1.442695, %v298_v19  ;;  %v83_v24 = vmul.f32 1.442695, %v300_v20  ;;  %v85_v26 = vmul.f32 1.442695, %v302_v21 }
  0xa8   :  { %v87_v28 = vmul.f32 1.442695, %v304_v22  ;;  %v89_v29 = vmul.f32 1.442695, %v308_v25  ;;  %v91_v30 = vmul.f32 1.442695, %v311_v27 }
  0xa9   :  { %204 = vpow2.f32 %v81_v23  ;;  %v140_v13 = vadd.f32 0.00013315579, %v134_v4 }
  0xaa   :  { %206 = vpow2.f32 %v83_v24 }
  0xab   :  { %208 = vpow2.f32 %v85_v26 }
  0xac   :  { %210 = vpow2.f32 %v87_v28 }
  0xad   :  { %212 = vpow2.f32 %v89_v29 }
  0xae   :  { %214 = vpow2.f32 %v91_v30 }
  0xb6   :  { %v205_v31 = vpop.eup %204 }
  0xb7   :  { %v207_v32 = vpop.eup %206 }
  0xb8   :  { %v93_v33 = vadd.f32 %v207_v32, %v205_v31  ;;  %v209_v34 = vpop.eup %208 }
  0xb9   :  { %v211_v36 = vpop.eup %210 }
  0xba   :  { %v94_v35 = vadd.f32 %v209_v34, %v93_v33  ;;  %v213_v38 = vpop.eup %212 }
  0xbb   :  { %v215_v40 = vpop.eup %214 }
  0xbc   :  { %v95_v37 = vadd.f32 %v211_v36, %v94_v35 }
  0xbe   :  { %v96_v39 = vadd.f32 %v213_v38, %v95_v37 }
  0xc0   :  { %v97_v41 = vadd.f32 %v215_v40, %v96_v39 }
  0xc2   :  { %98 = vadd.xlane.f32.xlu0 %v97_v41 }
 0x14b   :  { %v99_v42 = vpop.xlane.xlu0 %98 }
 0x14c   :  { %216 = vlog2.f32 %v99_v42 }
 0x159   :  { %v217_v58 = vpop.eup %216 }
 0x15a   :  { %v101_v62 = vmul.f32 0.6931472, %v217_v58 }
 0x15c   :  { %v102_v6 = vsub.f32 %v298_v19, %v101_v62  ;;  %v103_v7 = vsub.f32 %v300_v20, %v101_v62  ;;  %v104_v8 = vsub.f32 %v302_v21, %v101_v62  ;;  %v105_v9 = vsub.f32 %v304_v22, %v101_v62 }
 0x15d   :  { %v106_v10 = vsub.f32 %v308_v25, %v101_v62  ;;  %v107_v14 = vsub.f32 %v311_v27, %v101_v62 }
 0x15e   :  { %v141_v11 = vmul.f32 %v135_v59, %v102_v6  ;;  %v142_v0 = vmul.f32 %v136_v63, %v103_v7  ;;  %v143_v12 = vmul.f32 %v137_v2, %v104_v8  ;;  %v144_v15 = vmul.f32 %v138_v5, %v105_v9 }
 0x15f   :  { %v145_v19 = vmul.f32 %v139_v1, %v106_v10  ;;  %v146_v22 = vmul.f32 %v140_v13, %v107_v14 }
 0x160   :  { %v147_v16 = vsel %vm55_vm8, %v141_v11, 0.0  ;;  %v148_v17 = vsel %vm55_vm8, %v142_v0, 0.0  ;;  %v149_v20 = vsel %vm55_vm8, %v143_v12, 0.0  ;;  %v150_v23 = vsel %vm55_vm8, %v144_v15, 0.0 }
 0x161   :  { %v153_v18 = vadd.f32 %v148_v17, %v147_v16  ;;  %v151_v25 = vsel %vm55_vm8, %v145_v19, 0.0  ;;  %v152_v27 = vsel %vm61_vm9, %v146_v22, 0.0 }
 0x163   :  { %v154_v21 = vadd.f32 %v153_v18, %v149_v20 }
 0x165   :  { %v155_v24 = vadd.f32 %v154_v21, %v150_v23 }
 0x167   :  { %v156_v26 = vadd.f32 %v155_v24, %v151_v25 }
 0x169   :  { %v157_v28 = vadd.f32 %v156_v26, %v152_v27 }
 0x16b   :  { %158 = vadd.xlane.f32.xlu1 %v157_v28 }
 0x1f4   :  { %v159_v29 = vpop.xlane.xlu1 %158 }
 0x1f5   :  { %v160_v30 = vrot.slane %v159_v29, 4 }
 0x1f7   :  { %v161_v31 = vadd.f32 %v160_v30, %v159_v29 }
 0x1f9   :  { %v162_v32 = vrot.slane %v161_v31, 2 }
 0x1fb   :  { %v163_v33 = vadd.f32 %v162_v32, %v161_v31 }
 0x1fd   :  { %v164_v34 = vrot.slane %v163_v33, 1 }
 0x1ff   :  { %v165_v35 = vadd.f32 %v164_v34, %v163_v33 }
 0x201   :  { %196 = vpush %v165_v35 }
 0x232   :  { %s197_s1 = spop %196 }
 0x233   :  { %v167_v36 = vstv %s197_s1 }
 0x234   :  { %v168_v37 = vsub.f32 0.0, %v167_v36 }
 0x236   :  { %v170_v38 = vmul.f32 0.25, %v168_v37 }
 0x238   :  { %v172_v39 = vadd.f32 %v171_v3, %v170_v38 }
 0x23a   :  { %174 = vst.msk [vmem:[#allocation5] sm:$0x1] %vm28_vm0, %v172_v39 }
 0x23b   :  { %249 = shalt.err (!%p246_p9)
}
 0x23c   :  { %184 = dma.vmem_to_hbm [thread:$0]  %s182_s16, 16, %s349_s2, [#allocation4]  }
 0x23d   :  { %260 = dma.done.wait [#allocation4], 16  }
 0x23e   :  { %261 = vsyncadd [#allocation4], 4294967280 }
 0x23f   :  { %188 = vsyncpa [#allocation3], 1 }
 0x240   :  { %189 = vsyncpa [#allocation4], 1 }

</bundles_post_ra>
